<compile_context>
chip_gen: v7x
topology: tpu7x:2x2x1
jax: 0.10.0
libtpu: 0.0.40
codegen_flags: <defaults>
</compile_context>

<pallas_src>
import functools

import jax
import jax.numpy as jnp
from jax import lax
from jax.experimental import pallas as pl
from jax.experimental.pallas import tpu as pltpu

LANE = 128


def _round_up(x, m):
    return ((x + m - 1) // m) * m


def _dice_kernel(o_ref, t_ref, inter_ref, union_ref, acc_i, acc_u, *,
                 rows, tile_rows, steps):
    p = pl.program_id(0)          # part (parallel axis)
    i = pl.program_id(1)          # step within the part (arbitrary axis)

    @pl.when(i == 0)
    def _():
        acc_i[...] = jnp.zeros_like(acc_i)
        acc_u[...] = jnp.zeros_like(acc_u)

    o = o_ref[...].astype(jnp.float32)
    t = t_ref[...].astype(jnp.float32)

    # Global first row covered by this (unclamped) block.
    start = (p * steps + i) * tile_rows
    full = start + tile_rows <= rows

    @pl.when(full)
    def _():
        # Steady state: pure VPU elementwise accumulate, no cross-lane work.
        acc_i[...] += o * t
        acc_u[...] += o + t

    @pl.when(jnp.logical_not(full))
    def _():
        # Tail / overshoot block: zero rows past the true extent
        # (zero is sum-neutral for all three reductions).
        row_ids = start + lax.broadcasted_iota(jnp.int32, (tile_rows, LANE), 0)
        m = row_ids < rows
        om = jnp.where(m, o, 0.0)
        tm = jnp.where(m, t, 0.0)
        acc_i[...] += om * tm
        acc_u[...] += om + tm

    @pl.when(i == pl.num_programs(1) - 1)
    def _():
        # One sublane reduction per part; lane reduction + dice ratio happen
        # on the tiny per-part partials in the wrapper.
        inter_ref[...] = jnp.sum(acc_i[...], axis=0,
                                 keepdims=True).reshape(1, 1, LANE)
        union_ref[...] = jnp.sum(acc_u[...], axis=0,
                                 keepdims=True).reshape(1, 1, LANE)


def dice_loss(output, target, smooth=1e-6, tile_rows_max=2048, num_parts=2):
    """Pallas TPU implementation of DiceLoss.forward. Returns an f32 scalar."""
    assert output.shape == target.shape

    o_flat = output.reshape(-1)      # keep native dtype; cast happens in-kernel
    t_flat = target.reshape(-1)
    n = o_flat.shape[0]

    rem = n % LANE
    if rem:
        # TODO(synk): this rare path still materializes a padded copy; it could
        # be removed entirely with element-level masking against the true count.
        pad = LANE - rem
        o_flat = jnp.pad(o_flat, (0, pad))
        t_flat = jnp.pad(t_flat, (0, pad))

    rows = o_flat.shape[0] // LANE
    o2 = o_flat.reshape(rows, LANE)
    t2 = t_flat.reshape(rows, LANE)

    tile_rows = min(tile_rows_max, _round_up(rows, 8))
    total_blocks = pl.cdiv(rows, tile_rows)
    parts = max(1, min(num_parts, total_blocks))   # leading parallel axis
    steps = pl.cdiv(total_blocks, parts)

    if parts * steps > total_blocks:
        # Overshoot steps of the last part re-read the final block; the
        # in-kernel row mask (from the unclamped index) zeroes them out.
        def in_map(p, i):
            return (jnp.minimum(p * steps + i, total_blocks - 1), 0)
    else:
        def in_map(p, i):
            return (p * steps + i, 0)

    kernel = functools.partial(_dice_kernel, rows=rows, tile_rows=tile_rows,
                               steps=steps)

    out_spec = pl.BlockSpec((1, 1, LANE), lambda p, i: (p, 0, 0))
    inter_parts, union_parts = pl.pallas_call(
        kernel,
        out_shape=(jax.ShapeDtypeStruct((parts, 1, LANE), jnp.float32),
                   jax.ShapeDtypeStruct((parts, 1, LANE), jnp.float32)),
        grid=(parts, steps),
        in_specs=[pl.BlockSpec((tile_rows, LANE), in_map),
                  pl.BlockSpec((tile_rows, LANE), in_map)],
        out_specs=(out_spec, out_spec),
        scratch_shapes=[pltpu.VMEM((tile_rows, LANE), jnp.float32),
                        pltpu.VMEM((tile_rows, LANE), jnp.float32)],
        compiler_params=pltpu.CompilerParams(
            dimension_semantics=("parallel", "arbitrary")),
    )(o2, t2)

    intersection = jnp.sum(inter_parts)
    union = jnp.sum(union_parts)          # sum(o) + sum(t) == sum(o + t)
    dice = (2.0 * intersection + smooth) / (union + smooth)
    return (1.0 - dice).astype(jnp.float32)


def dice_loss_ref(output, target, smooth=1e-6):
    o = output.reshape(-1).astype(jnp.float32)
    t = target.reshape(-1).astype(jnp.float32)
    inter = jnp.sum(o * t)
    union = jnp.sum(o) + jnp.sum(t)
    return 1.0 - (2.0 * inter + smooth) / (union + smooth)


if __name__ == "__main__":
    key = jax.random.PRNGKey(0)
    k1, k2 = jax.random.split(key)
    # Small segmentation-style NCHW inputs.
    x = jax.nn.sigmoid(jax.random.normal(k1, (2, 4, 16, 16), dtype=jnp.float32))
    y = (jax.random.uniform(k2, (2, 4, 16, 16)) > 0.5).astype(jnp.float32)

    loss = jax.block_until_ready(dice_loss(x, y))
    ref = jax.block_until_ready(dice_loss_ref(x, y))
    assert jnp.allclose(loss, ref, rtol=1e-5, atol=1e-6), (loss, ref)

    # Also exercise the masked-tail / multi-step / two-part path.
    k3, k4 = jax.random.split(k2)
    x2 = jax.random.uniform(k3, (3, 5, 17, 13), dtype=jnp.float32)  # not lane-aligned
    y2 = (jax.random.uniform(k4, (3, 5, 17, 13)) > 0.5).astype(jnp.float32)
    loss2 = jax.block_until_ready(dice_loss(x2, y2, tile_rows_max=8))
    ref2 = jax.block_until_ready(dice_loss_ref(x2, y2))
    assert jnp.allclose(loss2, ref2, rtol=1e-5, atol=1e-6), (loss2, ref2)

    print("KERNEL_OK")
</pallas_src>

<mosaic_0001>
module attributes {stable_mosaic.version = 11 : i64} {
  func.func @_dice_kernel(%arg0: i32, %arg1: i32, %arg2: memref<16x128xf32, #tpu.memory_space<vmem>>, %arg3: memref<16x128xf32, #tpu.memory_space<vmem>>, %arg4: memref<1x1x128xf32, #tpu.memory_space<vmem>>, %arg5: memref<1x1x128xf32, #tpu.memory_space<vmem>>, %arg6: memref<16x128xf32, #tpu.memory_space<vmem>>, %arg7: memref<16x128xf32, #tpu.memory_space<vmem>>) attributes {dimension_semantics = [#tpu.dimension_semantics<parallel>, #tpu.dimension_semantics<arbitrary>], iteration_bounds = array<i64: 1, 1>, scalar_prefetch = 0 : i64, scratch_operands = 2 : i64, tpu.core_type = #tpu.core_type<tc>, window_params = [{transform_indices = @transform_0, window_bounds = array<i64: 16, 128>}, {transform_indices = @transform_1, window_bounds = array<i64: 16, 128>}, {transform_indices = @transform_2, window_bounds = array<i64: 1, 1, 128>}, {transform_indices = @transform_3, window_bounds = array<i64: 1, 1, 128>}]} {
    %c0_i32 = arith.constant 0 : i32
    %0 = arith.cmpi eq, %arg1, %c0_i32 : i32
    %1 = arith.extui %0 : i1 to i32
    %c0_i32_0 = arith.constant 0 : i32
    %2 = arith.cmpi ne, %1, %c0_i32_0 : i32
    scf.if %2 {
      %cst = arith.constant 0.000000e+00 : f32
      %18 = vector.broadcast %cst : f32 to vector<16x128xf32>
      %c0_10 = arith.constant 0 : index
      %c0_11 = arith.constant 0 : index
      %19 = vector.load %arg6[%c0_10, %c0_11] : memref<16x128xf32, #tpu.memory_space<vmem>>, vector<16x128xf32>
      tpu.vector_store %arg6[%c0_10, %c0_11], %18 {strides = array<i32>} : memref<16x128xf32, #tpu.memory_space<vmem>>, vector<16x128xf32>,
      %cst_12 = arith.constant 0.000000e+00 : f32
      %20 = vector.broadcast %cst_12 : f32 to vector<16x128xf32>
      %c0_13 = arith.constant 0 : index
      %c0_14 = arith.constant 0 : index
      %21 = vector.load %arg7[%c0_13, %c0_14] : memref<16x128xf32, #tpu.memory_space<vmem>>, vector<16x128xf32>
      tpu.vector_store %arg7[%c0_13, %c0_14], %20 {strides = array<i32>} : memref<16x128xf32, #tpu.memory_space<vmem>>, vector<16x128xf32>,
    } else {
    }
    %c0 = arith.constant 0 : index
    %c0_1 = arith.constant 0 : index
    %3 = vector.load %arg2[%c0, %c0_1] : memref<16x128xf32, #tpu.memory_space<vmem>>, vector<16x128xf32>
    %c0_2 = arith.constant 0 : index
    %c0_3 = arith.constant 0 : index
    %4 = vector.load %arg3[%c0_2, %c0_3] : memref<16x128xf32, #tpu.memory_space<vmem>>, vector<16x128xf32>
    %c1_i32 = arith.constant 1 : i32
    %5 = arith.muli %arg0, %c1_i32 : i32
    %6 = arith.addi %5, %arg1 : i32
    %c16_i32 = arith.constant 16 : i32
    %7 = arith.muli %6, %c16_i32 : i32
    %c16_i32_4 = arith.constant 16 : i32
    %8 = arith.addi %7, %c16_i32_4 : i32
    %c16_i32_5 = arith.constant 16 : i32
    %9 = arith.cmpi sle, %8, %c16_i32_5 : i32
    %10 = arith.extui %9 : i1 to i32
    %c0_i32_6 = arith.constant 0 : i32
    %11 = arith.cmpi ne, %10, %c0_i32_6 : i32
    scf.if %11 {
      %c0_10 = arith.constant 0 : index
      %c0_11 = arith.constant 0 : index
      %18 = vector.load %arg6[%c0_10, %c0_11] : memref<16x128xf32, #tpu.memory_space<vmem>>, vector<16x128xf32>
      %19 = arith.mulf %3, %4 : vector<16x128xf32>
      %20 = arith.addf %18, %19 : vector<16x128xf32>
      %c0_12 = arith.constant 0 : index
      %c0_13 = arith.constant 0 : index
      %21 = vector.load %arg6[%c0_12, %c0_13] : memref<16x128xf32, #tpu.memory_space<vmem>>, vector<16x128xf32>
      tpu.vector_store %arg6[%c0_12, %c0_13], %20 {strides = array<i32>} : memref<16x128xf32, #tpu.memory_space<vmem>>, vector<16x128xf32>,
      %c0_14 = arith.constant 0 : index
      %c0_15 = arith.constant 0 : index
      %22 = vector.load %arg7[%c0_14, %c0_15] : memref<16x128xf32, #tpu.memory_space<vmem>>, vector<16x128xf32>
      %23 = arith.addf %3, %4 : vector<16x128xf32>
      %24 = arith.addf %22, %23 : vector<16x128xf32>
      %c0_16 = arith.constant 0 : index
      %c0_17 = arith.constant 0 : index
      %25 = vector.load %arg7[%c0_16, %c0_17] : memref<16x128xf32, #tpu.memory_space<vmem>>, vector<16x128xf32>
      tpu.vector_store %arg7[%c0_16, %c0_17], %24 {strides = array<i32>} : memref<16x128xf32, #tpu.memory_space<vmem>>, vector<16x128xf32>,
    } else {
    }
    %true = arith.constant true
    %12 = arith.xori %9, %true : i1
    %13 = arith.extui %12 : i1 to i32
    %c0_i32_7 = arith.constant 0 : i32
    %14 = arith.cmpi ne, %13, %c0_i32_7 : i32
    scf.if %14 {
      %18 = tpu.iota {dimensions = array<i32: 0>} : vector<16x128xi32>
      %19 = vector.broadcast %7 : i32 to vector<16x128xi32>
      %20 = arith.addi %19, %18 : vector<16x128xi32>
      %c16_i32_10 = arith.constant 16 : i32
      %21 = vector.broadcast %c16_i32_10 : i32 to vector<16x128xi32>
      %22 = arith.cmpi slt, %20, %21 : vector<16x128xi32>
      %cst = arith.constant 0.000000e+00 : f32
      %23 = vector.broadcast %cst : f32 to vector<16x128xf32>
      %24 = arith.select %22, %3, %23 : vector<16x128xi1>, vector<16x128xf32>
      %cst_11 = arith.constant 0.000000e+00 : f32
      %25 = vector.broadcast %cst_11 : f32 to vector<16x128xf32>
      %26 = arith.select %22, %4, %25 : vector<16x128xi1>, vector<16x128xf32>
      %c0_12 = arith.constant 0 : index
      %c0_13 = arith.constant 0 : index
      %27 = vector.load %arg6[%c0_12, %c0_13] : memref<16x128xf32, #tpu.memory_space<vmem>>, vector<16x128xf32>
      %28 = arith.mulf %24, %26 : vector<16x128xf32>
      %29 = arith.addf %27, %28 : vector<16x128xf32>
      %c0_14 = arith.constant 0 : index
      %c0_15 = arith.constant 0 : index
      %30 = vector.load %arg6[%c0_14, %c0_15] : memref<16x128xf32, #tpu.memory_space<vmem>>, vector<16x128xf32>
      tpu.vector_store %arg6[%c0_14, %c0_15], %29 {strides = array<i32>} : memref<16x128xf32, #tpu.memory_space<vmem>>, vector<16x128xf32>,
      %c0_16 = arith.constant 0 : index
      %c0_17 = arith.constant 0 : index
      %31 = vector.load %arg7[%c0_16, %c0_17] : memref<16x128xf32, #tpu.memory_space<vmem>>, vector<16x128xf32>
      %32 = arith.addf %24, %26 : vector<16x128xf32>
      %33 = arith.addf %31, %32 : vector<16x128xf32>
      %c0_18 = arith.constant 0 : index
      %c0_19 = arith.constant 0 : index
      %34 = vector.load %arg7[%c0_18, %c0_19] : memref<16x128xf32, #tpu.memory_space<vmem>>, vector<16x128xf32>
      tpu.vector_store %arg7[%c0_18, %c0_19], %33 {strides = array<i32>} : memref<16x128xf32, #tpu.memory_space<vmem>>, vector<16x128xf32>,
    } else {
    }
    %c0_i32_8 = arith.constant 0 : i32
    %15 = arith.cmpi eq, %arg1, %c0_i32_8 : i32
    %16 = arith.extui %15 : i1 to i32
    %c0_i32_9 = arith.constant 0 : i32
    %17 = arith.cmpi ne, %16, %c0_i32_9 : i32
    scf.if %17 {
      %c0_10 = arith.constant 0 : index
      %c0_11 = arith.constant 0 : index
      %18 = vector.load %arg6[%c0_10, %c0_11] : memref<16x128xf32, #tpu.memory_space<vmem>>, vector<16x128xf32>
      %cst = arith.constant dense<0.000000e+00> : vector<128xf32>
      %19 = vector.multi_reduction <add>, %18, %cst [0] : vector<16x128xf32> to vector<128xf32>
      %20 = vector.shape_cast %19 : vector<128xf32> to vector<1x128xf32>
      %21 = vector.shape_cast %20 : vector<1x128xf32> to vector<1x1x128xf32>
      %c0_12 = arith.constant 0 : index
      %c0_13 = arith.constant 0 : index
      %c0_14 = arith.constant 0 : index
      %22 = vector.load %arg4[%c0_12, %c0_13, %c0_14] : memref<1x1x128xf32, #tpu.memory_space<vmem>>, vector<1x1x128xf32>
      tpu.vector_store %arg4[%c0_12, %c0_13, %c0_14], %21 {strides = array<i32>} : memref<1x1x128xf32, #tpu.memory_space<vmem>>, vector<1x1x128xf32>,
      %c0_15 = arith.constant 0 : index
      %c0_16 = arith.constant 0 : index
      %23 = vector.load %arg7[%c0_15, %c0_16] : memref<16x128xf32, #tpu.memory_space<vmem>>, vector<16x128xf32>
      %cst_17 = arith.constant dense<0.000000e+00> : vector<128xf32>
      %24 = vector.multi_reduction <add>, %23, %cst_17 [0] : vector<16x128xf32> to vector<128xf32>
      %25 = vector.shape_cast %24 : vector<128xf32> to vector<1x128xf32>
      %26 = vector.shape_cast %25 : vector<1x128xf32> to vector<1x1x128xf32>
      %c0_18 = arith.constant 0 : index
      %c0_19 = arith.constant 0 : index
      %c0_20 = arith.constant 0 : index
      %27 = vector.load %arg5[%c0_18, %c0_19, %c0_20] : memref<1x1x128xf32, #tpu.memory_space<vmem>>, vector<1x1x128xf32>
      tpu.vector_store %arg5[%c0_18, %c0_19, %c0_20], %26 {strides = array<i32>} : memref<1x1x128xf32, #tpu.memory_space<vmem>>, vector<1x1x128xf32>,
    } else {
    }
    return
  }
  func.func @transform_0(%arg0: i32, %arg1: i32) -> (i32, i32) {
    %c1_i32 = arith.constant 1 : i32
    %0 = arith.muli %arg0, %c1_i32 : i32
    %1 = arith.addi %0, %arg1 : i32
    %c0_i32 = arith.constant 0 : i32
    %c0_i32_0 = arith.constant 0 : i32
    return %1, %c0_i32 : i32, i32
  }
  func.func @transform_1(%arg0: i32, %arg1: i32) -> (i32, i32) {
    %c1_i32 = arith.constant 1 : i32
    %0 = arith.muli %arg0, %c1_i32 : i32
    %1 = arith.addi %0, %arg1 : i32
    %c0_i32 = arith.constant 0 : i32
    %c0_i32_0 = arith.constant 0 : i32
    return %1, %c0_i32 : i32, i32
  }
  func.func @transform_2(%arg0: i32, %arg1: i32) -> (i32, i32, i32) {
    %c0_i32 = arith.constant 0 : i32
    %c0_i32_0 = arith.constant 0 : i32
    %c0_i32_1 = arith.constant 0 : i32
    return %arg0, %c0_i32, %c0_i32_0 : i32, i32, i32
  }
  func.func @transform_3(%arg0: i32, %arg1: i32) -> (i32, i32, i32) {
    %c0_i32 = arith.constant 0 : i32
    %c0_i32_0 = arith.constant 0 : i32
    %c0_i32_1 = arith.constant 0 : i32
    return %arg0, %c0_i32, %c0_i32_0 : i32, i32, i32
  }
}

</mosaic_0001>

<bundles_post_ra>
// kernel: tpu_custom_call.1
= control target key start
LH: loop header
LB: loop body
LE: loop exit
PB: predicated region body
PF: predicated region fallthrough
CT: control target
= control target key end

     0   :  { %9 = vsyncpa [#allocation5], 0  ;;  %s359_s0 = inlined_call_operand.hbm [shape: f32[16,128], index: 0, kind: input, shape index: {}]   ;;  %s360_s1 = inlined_call_operand.hbm [shape: f32[16,128], index: 1, kind: input, shape index: {}]   ;;  %s361_s2 = inlined_call_operand.hbm [shape: f32[1,1,128], index: 2, kind: output, shape index: {0}]   ;;  %s362_s3 = inlined_call_operand.hbm [shape: f32[1,1,128], index: 3, kind: output, shape index: {1}]  }
   0x1   :  { %10 = vsyncpa [#allocation8], 0 }
   0x2   :  { %11 = vsyncpa [#allocation6], 0 }
   0x3   :  { %12 = vsyncpa [#allocation11], 0  ;;  %s277_s12 = smov [#allocation4]   ;;  %s181_s16 = scalar_lea.hbm %s359_s0, 256 }
   0x4   :  { %s22_s13 = sshll.u32 %s277_s12, 4  ;;  %p182_p0 = scmp.ne.s32.totalorder %s359_s0, %s181_s16  ;;  %s23_s13 = int_to_ptr.vmem [resolvable:$true] %s22_s13 }
   0x5   :  { %p185_p1 = scmp.lt.u32.totalorder %s181_s16, %s359_s0 }
   0x7   :  { %p187_p2 = pnand %p185_p1, %p182_p0 }
   0x9   :  { %190 = shalt.err (!%p187_p2)
}
   0xa   :  { %s191_s21 = scalar_lea.vmem %s23_s13, 256  ;;  %p196_p4 = scmp.lt.s32.totalorder %s23_s13, %s23_s13 }
   0xb   :  { %p192_p3 = scmp.ne.s32.totalorder %s23_s13, %s191_s21  ;;  %p197_p5 = scmp.lt.s32.totalorder %s191_s21, %s191_s21 }
   0xd   :  { %p198_p6 = por %p197_p5, %p196_p4 }
   0xf   :  { %p199_p7 = pnand %p198_p6, %p192_p3 }
  0x11   :  { %202 = shalt.err (!%p199_p7)
}
  0x12   :  { %s278_s22 = smov 128   ;;  %s279_s23 = smov 8  }
  0x13   :  { %28 = dma.hbm_to_vmem [thread:$0]  %s359_s0, 256, %s23_s13, [#allocation5], %s278_s22, %s278_s22, %s279_s23  }
  0x14   :  { %s280_s26 = smov [#allocation7]   ;;  %s203_s30 = scalar_lea.hbm %s360_s1, 256 }
  0x15   :  { %s38_s27 = sshll.u32 %s280_s26, 4  ;;  %p204_p8 = scmp.ne.s32.totalorder %s360_s1, %s203_s30  ;;  %s39_s27 = int_to_ptr.vmem [resolvable:$true] %s38_s27 }
  0x16   :  { %p207_p9 = scmp.lt.u32.totalorder %s203_s30, %s360_s1 }
  0x18   :  { %p209_p10 = pnand %p207_p9, %p204_p8 }
  0x1a   :  { %212 = shalt.err (!%p209_p10)
}
  0x1b   :  { %s213_s8 = scalar_lea.vmem %s39_s27, 256  ;;  %p218_p12 = scmp.lt.s32.totalorder %s39_s27, %s39_s27 }
  0x1c   :  { %p214_p11 = scmp.ne.s32.totalorder %s39_s27, %s213_s8  ;;  %p219_p13 = scmp.lt.s32.totalorder %s213_s8, %s213_s8 }
  0x1e   :  { %p220_p0 = por %p219_p13, %p218_p12 }
  0x20   :  { %p221_p1 = pnand %p220_p0, %p214_p11 }
  0x22   :  { %224 = shalt.err (!%p221_p1)
}
  0x23   :  { %44 = dma.hbm_to_vmem [thread:$0]  %s360_s1, 256, %s39_s27, [#allocation8], %s278_s22, %s278_s22, %s279_s23  }
  0x24   :  { %269 = dma.done.wait [#allocation5], 256  }
  0x25   :  { %270 = vsyncadd [#allocation5], 4294967040 }
  0x26   :  { %271 = dma.done.wait [#allocation8], 256  }
  0x27   :  { %272 = vsyncadd [#allocation8], 4294967040  ;;  %v63_v0 = vld [vmem:[#allocation4] sm:$0xff]  ;;  %v64_v1 = vld [vmem:[#allocation4 + $0x8] sm:$0xff]  ;;  %s281_s1 = smov [#allocation9]   ;;  %s282_s11 = smov [#allocation10]  }
  0x28   :  { %v65_v2 = vld [vmem:[#allocation7] sm:$0xff]  ;;  %v66_v3 = vld [vmem:[#allocation7 + $0x8] sm:$0xff]  ;;  %s151_s10 = sshll.u32 %s281_s1, 4  ;;  %s161_s12 = sshll.u32 %s282_s11, 4  ;;  %s152_s10 = int_to_ptr.vmem [resolvable:$true] %s151_s10  ;;  %s327_s12 = int_to_ptr.vmem [resolvable:$true] %s161_s12 }
  0x29   :  { %v76_v4 = vmul.f32 %v65_v2, %v63_v0  ;;  %v84_v5 = vadd.f32 %v65_v2, %v63_v0  ;;  %v77_v6 = vmul.f32 %v66_v3, %v64_v1  ;;  %v85_v7 = vadd.f32 %v66_v3, %v64_v1  ;;  %s225_s13 = scalar_lea.vmem %s152_s10, 16  ;;  %s229_s14 = scalar_lea.vmem %s152_s10, 32 }
  0x2a   :  { %p226_p2 = scmp.ne.s32.totalorder %s152_s10, %s225_s13  ;;  %p230_p3 = scmp.lt.s32.totalorder %s152_s10, %s152_s10 }
  0x2b   :  { %v127_v8 = vadd.f32 %v77_v6, %v76_v4  ;;  %v137_v9 = vadd.f32 %v85_v7, %v84_v5  ;;  %p231_p4 = scmp.lt.s32.totalorder %s229_s14, %s225_s13 }
  0x2d   :  { %v128_v10 = vrot.slane %v127_v8, 4  ;;  %v138_v11 = vrot.slane %v137_v9, 4  ;;  %p232_p5 = por %p231_p4, %p230_p3 }
  0x2f   :  { %v129_v12 = vadd.f32 %v128_v10, %v127_v8  ;;  %v139_v13 = vadd.f32 %v138_v11, %v137_v9  ;;  %p233_p6 = pnand %p232_p5, %p226_p2 }
  0x31   :  { %v130_v14 = vrot.slane %v129_v12, 2  ;;  %v140_v15 = vrot.slane %v139_v13, 2 }
  0x33   :  { %v131_v16 = vadd.f32 %v130_v14, %v129_v12  ;;  %v141_v17 = vadd.f32 %v140_v15, %v139_v13 }
  0x35   :  { %v132_v18 = vrot.slane %v131_v16, 1  ;;  %v142_v19 = vrot.slane %v141_v17, 1 }
  0x37   :  { %v133_v20 = vadd.f32 %v132_v18, %v131_v16  ;;  %v143_v21 = vadd.f32 %v142_v19, %v141_v17 }
  0x39   :  { %134 = vst [vmem:[#allocation9] sm:$0x1] %v133_v20  ;;  %144 = vst [vmem:[#allocation10] sm:$0x1] %v143_v21 }
  0x3a   :  { %236 = shalt.err (!%p233_p6)
}
  0x3b   :  { %s237_s17 = scalar_lea.hbm %s361_s2, 16 }
  0x3c   :  { %p238_p7 = scmp.ne.s32.totalorder %s361_s2, %s237_s17  ;;  %p241_p8 = scmp.lt.u32.totalorder %s237_s17, %s361_s2 }
  0x3e   :  { %p243_p9 = pnand %p241_p8, %p238_p7 }
  0x40   :  { %246 = shalt.err (!%p243_p9)
}
  0x41   :  { %154 = dma.vmem_to_hbm [thread:$0]  %s152_s10, 16, %s361_s2, [#allocation6]  }
  0x42   :  { %s247_s24 = scalar_lea.vmem %s327_s12, 16  ;;  %s251_s25 = scalar_lea.vmem %s327_s12, 32 }
  0x43   :  { %p248_p10 = scmp.ne.s32.totalorder %s327_s12, %s247_s24  ;;  %p252_p11 = scmp.lt.s32.totalorder %s327_s12, %s327_s12 }
  0x44   :  { %p253_p12 = scmp.lt.s32.totalorder %s251_s25, %s247_s24 }
  0x46   :  { %p254_p13 = por %p253_p12, %p252_p11 }
  0x48   :  { %p255_p0 = pnand %p254_p13, %p248_p10 }
  0x4a   :  { %258 = shalt.err (!%p255_p0)
}
  0x4b   :  { %s259_s28 = scalar_lea.hbm %s362_s3, 16 }
  0x4c   :  { %p260_p1 = scmp.ne.s32.totalorder %s362_s3, %s259_s28  ;;  %p263_p2 = scmp.lt.u32.totalorder %s259_s28, %s362_s3 }
  0x4e   :  { %p265_p3 = pnand %p263_p2, %p260_p1 }
  0x50   :  { %268 = shalt.err (!%p265_p3)
}
  0x51   :  { %164 = dma.vmem_to_hbm [thread:$0]  %s327_s12, 16, %s362_s3, [#allocation11]  }
  0x52   :  { %273 = dma.done.wait [#allocation6], 16  }
  0x53   :  { %274 = vsyncadd [#allocation6], 4294967280 }
  0x54   :  { %275 = dma.done.wait [#allocation11], 16  }
  0x55   :  { %276 = vsyncadd [#allocation11], 4294967280 }
  0x56   :  { %171 = vsyncpa [#allocation5], 1 }
  0x57   :  { %172 = vsyncpa [#allocation8], 1 }
  0x58   :  { %173 = vsyncpa [#allocation6], 1 }
  0x59   :  { %174 = vsyncpa [#allocation11], 1 }

</bundles_post_ra>
